<compile_context>
chip_gen: v7x
topology: tpu7x:2x2x1
jax: 0.10.0
libtpu: 0.0.40
codegen_flags: <defaults>
</compile_context>

<pallas_src>
import functools

import jax
import jax.numpy as jnp
from jax.experimental import pallas as pl
from jax.experimental.pallas import tpu as pltpu

_LANES = 128


def _round_up(n: int, m: int = _LANES) -> int:
    return ((n + m - 1) // m) * m


def _fused_mlp_kernel(x_ref, *refs, apply_tanh):
    """refs = (w1, s1, w2, s2, ..., wL, sL, o_ref). All operands live in VMEM.

    Per layer: y = y @ W' + shift'   (Linear + folded eval-mode BatchNorm1d)
               y = tanh(y)           (optional activation)
    Dropout is identity at inference. Matmul operands are cast to the stored
    weight dtype (bf16); accumulation, bias add and tanh are f32.
    """
    o_ref = refs[-1]
    layer_refs = refs[:-1]
    y = x_ref[...].astype(jnp.float32)
    for li, use_tanh in enumerate(apply_tanh):
        w = layer_refs[2 * li][...]          # (K, Np) bf16 (or f32)
        s = layer_refs[2 * li + 1][...]      # (1, Np) f32
        y = jnp.dot(y.astype(w.dtype), w, preferred_element_type=jnp.float32) + s
        if use_tanh:
            y = jnp.tanh(y)                  # EUP, f32
    o_ref[...] = y.astype(o_ref.dtype)


def fused_mlp_forward(x, fused_params, *, batch_tile=256):
    """Run the whole MLP in a single Pallas kernel, gridded over batch rows.

    x: (B, input_dim) float32 (logical, unpadded)
    fused_params: dict with
        'w_pad'      : list of (K, Np) folded weights (bf16), N padded to 128
        's_pad'      : list of (1, Np) f32 folded shifts
        'apply_tanh' : tuple of bool per layer
        'in_dim'     : logical input dim
        'out_dim'    : logical final output dim
    """
    x = x.astype(jnp.float32)
    B, in_dim = x.shape
    assert in_dim == fused_params["in_dim"]

    w_pads = fused_params["w_pad"]
    s_pads = fused_params["s_pad"]
    apply_tanh = tuple(fused_params["apply_tanh"])
    out_pad = w_pads[-1].shape[1]

    # Batch tile: multiple of 16 (bf16 sublane packing), capped at `batch_tile`
    # so the chained (tb, 128) f32 intermediates fit the vreg file.
    tb = min(batch_tile, _round_up(B, 16))
    b_pad = _round_up(B, tb)
    if b_pad != B:
        x = jnp.pad(x, ((0, b_pad - B), (0, 0)))  # rows only; feature dim untouched
    grid = (b_pad // tb,)

    # VMEM sanity guard: resident weights/shifts + double-buffered x/out blocks.
    resident_bytes = sum(
        w.size * jnp.dtype(w.dtype).itemsize + s.size * 4 for w, s in zip(w_pads, s_pads)
    ) + 2 * (tb * in_dim * 4 + tb * out_pad * 4)
    assert resident_bytes < 16 * 1024 * 1024, (
        "Weights too large for the all-resident design; switch to K/N-tiled "
        "BlockSpecs with an accumulator scratch (v7x VMEM is only 64 MiB)."
    )

    in_specs = [pl.BlockSpec((tb, in_dim), lambda i: (i, 0))]
    inputs = [x]
    for w, s in zip(w_pads, s_pads):
        in_specs.append(pl.BlockSpec(w.shape, lambda i: (0, 0)))  # resident, loaded once
        in_specs.append(pl.BlockSpec(s.shape, lambda i: (0, 0)))  # resident, loaded once
        inputs.append(w)
        inputs.append(s)
    out_spec = pl.BlockSpec((tb, out_pad), lambda i: (i, 0))

    # Advisory cost estimate (padded sizes).
    flops = 2 * b_pad * sum(w.shape[0] * w.shape[1] for w in w_pads)
    transcendentals = b_pad * sum(w.shape[1] for w, t in zip(w_pads, apply_tanh) if t)
    bytes_accessed = (
        4 * x.size
        + sum(w.size * jnp.dtype(w.dtype).itemsize + s.size * 4 for w, s in zip(w_pads, s_pads))
        + 4 * b_pad * out_pad
    )

    kernel = functools.partial(_fused_mlp_kernel, apply_tanh=apply_tanh)
    out_padded = pl.pallas_call(
        kernel,
        out_shape=jax.ShapeDtypeStruct((b_pad, out_pad), jnp.float32),
        grid=grid,
        in_specs=in_specs,
        out_specs=out_spec,
        compiler_params=pltpu.CompilerParams(dimension_semantics=("parallel",)),
        cost_estimate=pl.CostEstimate(
            flops=flops,
            transcendentals=transcendentals,
            bytes_accessed=bytes_accessed,
        ),
    )(*inputs)

    # Slice padded rows / padded output columns back to the logical shape.
    return out_padded[:B, : fused_params["out_dim"]]


def init_mlp_params(key, input_dim, layer_cfgs, *, weight_dtype=jnp.bfloat16):
    """Deterministic parameter init mirroring the PyTorch module's shapes.

    layer_cfgs: list of (out_dim, drop_p, batch_norm, use_tanh)

    Returns (logical_params, fused_params):
      logical_params: per-layer dicts with w (K,N), b (N,), scale (N,), shift (N,)
                      for the pure-JAX f32 reference.
      fused_params:   BN+bias folded into weights; only N (lane) dims padded to 128;
                      weights stored in `weight_dtype` (bf16 by default), shifts f32.
    """
    eps = 1e-5
    logical_params = []
    in_dim = input_dim
    for (out_dim, _drop_p, batch_norm, use_tanh) in layer_cfgs:
        key, kw, kb, km, kv = jax.random.split(key, 5)
        bound = 1.0 / jnp.sqrt(jnp.float32(in_dim))
        # nn.Linear: weight (out_dim, in_dim) uniform(-bound, bound); stored transposed.
        w = jax.random.uniform(kw, (in_dim, out_dim), jnp.float32, -bound, bound)
        b = jax.random.uniform(kb, (out_dim,), jnp.float32, -bound, bound)
        if batch_norm:
            # nn.BatchNorm1d eval mode with (deterministically perturbed) running stats.
            gamma = jnp.ones((out_dim,), jnp.float32)
            beta = jnp.zeros((out_dim,), jnp.float32)
            running_mean = 0.1 * jax.random.normal(km, (out_dim,), jnp.float32)
            running_var = 1.0 + 0.1 * jax.random.uniform(kv, (out_dim,), jnp.float32)
            scale = gamma / jnp.sqrt(running_var + eps)
            shift = beta - running_mean * scale
        else:
            scale = jnp.ones((out_dim,), jnp.float32)
            shift = jnp.zeros((out_dim,), jnp.float32)
        logical_params.append(
            dict(w=w, b=b, scale=scale, shift=shift, apply_tanh=use_tanh)
        )
        in_dim = out_dim

    # Fold BN into weights. K dim of the first layer is NOT padded (x is fed at its
    # logical width); subsequent K dims equal the previous layer's padded N width
    # (those extra rows multiply exactly-zero activation columns). N dims pad to 128.
    w_pad_list, s_pad_list, tanh_flags = [], [], []
    k_pad = input_dim
    for p in logical_params:
        w, b, scale, shift = p["w"], p["b"], p["scale"], p["shift"]
        k, n = w.shape
        n_pad = _round_up(n)
        w_folded = (w * scale[None, :]).astype(weight_dtype)   # (K, N)
        s_folded = b * scale + shift                           # (N,), f32
        w_padded = jnp.zeros((k_pad, n_pad), weight_dtype).at[:k, :n].set(w_folded)
        s_padded = jnp.zeros((1, n_pad), jnp.float32).at[0, :n].set(s_folded)
        w_pad_list.append(w_padded)
        s_pad_list.append(s_padded)
        tanh_flags.append(p["apply_tanh"])
        k_pad = n_pad

    fused_params = dict(
        w_pad=w_pad_list,
        s_pad=s_pad_list,
        apply_tanh=tuple(tanh_flags),
        in_dim=input_dim,
        out_dim=layer_cfgs[-1][0],
    )
    return logical_params, fused_params


if __name__ == "__main__":
    key = jax.random.PRNGKey(0)
    key_x, key_p = jax.random.split(key)

    # Config consistent with the module:
    #   MLP(input_dim=32, layers=[(64, 0.0, True, Tanh), (32, 0.1, True, Tanh), (16, 0.0, False, None)])
    # Batch chosen so the MXU sees >=256 LHS rows and the grid has >1 step (still tiny: 64 KiB).
    batch = 512
    input_dim = 32
    layer_cfgs = [
        (64, 0.0, True, True),
        (32, 0.1, True, True),   # dropout p=0.1 -> identity at inference
        (16, 0.0, False, False),
    ]

    x = jax.random.normal(key_x, (batch, input_dim), jnp.float32)
    logical_params, fused_params = init_mlp_params(key_p, input_dim, layer_cfgs)

    out = fused_mlp_forward(x, fused_params)
    out = jax.block_until_ready(out)
    assert out.shape == (batch, layer_cfgs[-1][0])

    # Reference 1: mirrors the kernel's bf16 operand rounding (f32 accumulation),
    # so it should match tightly.
    ref_bf16 = x
    for w_p, s_p, t in zip(
        fused_params["w_pad"], fused_params["s_pad"], fused_params["apply_tanh"]
    ):
        ref_bf16 = (
            jnp.dot(
                ref_bf16.astype(w_p.dtype).astype(jnp.float32),
                w_p.astype(jnp.float32),
            )
            + s_p
        )
        if t:
            ref_bf16 = jnp.tanh(ref_bf16)
    ref_bf16 = ref_bf16[:, : fused_params["out_dim"]]
    assert jnp.allclose(out, ref_bf16, atol=1e-4, rtol=1e-4)

    # Reference 2: pure-f32 reference of the original (unfolded) layer sequence;
    # loose tolerance accounts for bf16 weight rounding.
    ref_f32 = x.astype(jnp.float32)
    for p in logical_params:
        ref_f32 = ref_f32 @ p["w"] + p["b"][None, :]
        ref_f32 = ref_f32 * p["scale"][None, :] + p["shift"][None, :]
        if p["apply_tanh"]:
            ref_f32 = jnp.tanh(ref_f32)
    assert jnp.allclose(out, ref_f32, atol=5e-2, rtol=5e-2)

    print("KERNEL_OK")
</pallas_src>

<mosaic_0001>
module attributes {stable_mosaic.version = 11 : i64} {
  func.func @_fused_mlp_kernel(%arg0: i32, %arg1: memref<256x32xf32, #tpu.memory_space<vmem>>, %arg2: memref<32x128xbf16, #tpu.memory_space<vmem>>, %arg3: memref<1x128xf32, #tpu.memory_space<vmem>>, %arg4: memref<128x128xbf16, #tpu.memory_space<vmem>>, %arg5: memref<1x128xf32, #tpu.memory_space<vmem>>, %arg6: memref<128x128xbf16, #tpu.memory_space<vmem>>, %arg7: memref<1x128xf32, #tpu.memory_space<vmem>>, %arg8: memref<256x128xf32, #tpu.memory_space<vmem>>) attributes {dimension_semantics = [#tpu.dimension_semantics<parallel>], iteration_bounds = array<i64: 2>, scalar_prefetch = 0 : i64, scratch_operands = 0 : i64, tpu.core_type = #tpu.core_type<tc>, window_params = [{transform_indices = @transform_0, window_bounds = array<i64: 256, 32>}, {pipeline_mode = #tpu.pipeline_mode<synchronous>, transform_indices = @transform_1, window_bounds = array<i64: 32, 128>}, {pipeline_mode = #tpu.pipeline_mode<synchronous>, transform_indices = @transform_2, window_bounds = array<i64: 1, 128>}, {pipeline_mode = #tpu.pipeline_mode<synchronous>, transform_indices = @transform_3, window_bounds = array<i64: 128, 128>}, {pipeline_mode = #tpu.pipeline_mode<synchronous>, transform_indices = @transform_4, window_bounds = array<i64: 1, 128>}, {pipeline_mode = #tpu.pipeline_mode<synchronous>, transform_indices = @transform_5, window_bounds = array<i64: 128, 128>}, {pipeline_mode = #tpu.pipeline_mode<synchronous>, transform_indices = @transform_6, window_bounds = array<i64: 1, 128>}, {transform_indices = @transform_7, window_bounds = array<i64: 256, 128>}]} {
    %c0 = arith.constant 0 : index
    %c0_0 = arith.constant 0 : index
    %0 = vector.load %arg1[%c0, %c0_0] : memref<256x32xf32, #tpu.memory_space<vmem>>, vector<256x32xf32>
    %c0_1 = arith.constant 0 : index
    %c0_2 = arith.constant 0 : index
    %1 = vector.load %arg2[%c0_1, %c0_2] : memref<32x128xbf16, #tpu.memory_space<vmem>>, vector<32x128xbf16>
    %c0_3 = arith.constant 0 : index
    %c0_4 = arith.constant 0 : index
    %2 = vector.load %arg3[%c0_3, %c0_4] : memref<1x128xf32, #tpu.memory_space<vmem>>, vector<1x128xf32>
    %3 = arith.truncf %0 : vector<256x32xf32> to vector<256x32xbf16>
    %cst = arith.constant dense<0.000000e+00> : vector<256x128xf32>
    %4 = tpu.matmul %3, %1, %cst {dimension_numbers = #tpu.dot_dimension_numbers<[1], [0], [0], [1], [0, 0, 1, 1], [], []>} : vector<256x32xbf16>, vector<32x128xbf16>, vector<256x128xf32> -> vector<256x128xf32>
    %5 = vector.broadcast %2 : vector<1x128xf32> to vector<256x128xf32>
    %6 = arith.addf %4, %5 : vector<256x128xf32>
    %7 = math.tanh %6 : vector<256x128xf32>
    %c0_5 = arith.constant 0 : index
    %c0_6 = arith.constant 0 : index
    %8 = vector.load %arg4[%c0_5, %c0_6] : memref<128x128xbf16, #tpu.memory_space<vmem>>, vector<128x128xbf16>
    %c0_7 = arith.constant 0 : index
    %c0_8 = arith.constant 0 : index
    %9 = vector.load %arg5[%c0_7, %c0_8] : memref<1x128xf32, #tpu.memory_space<vmem>>, vector<1x128xf32>
    %10 = arith.truncf %7 : vector<256x128xf32> to vector<256x128xbf16>
    %cst_9 = arith.constant dense<0.000000e+00> : vector<256x128xf32>
    %11 = tpu.matmul %10, %8, %cst_9 {dimension_numbers = #tpu.dot_dimension_numbers<[1], [0], [0], [1], [0, 0, 1, 1], [], []>} : vector<256x128xbf16>, vector<128x128xbf16>, vector<256x128xf32> -> vector<256x128xf32>
    %12 = vector.broadcast %9 : vector<1x128xf32> to vector<256x128xf32>
    %13 = arith.addf %11, %12 : vector<256x128xf32>
    %14 = math.tanh %13 : vector<256x128xf32>
    %c0_10 = arith.constant 0 : index
    %c0_11 = arith.constant 0 : index
    %15 = vector.load %arg6[%c0_10, %c0_11] : memref<128x128xbf16, #tpu.memory_space<vmem>>, vector<128x128xbf16>
    %c0_12 = arith.constant 0 : index
    %c0_13 = arith.constant 0 : index
    %16 = vector.load %arg7[%c0_12, %c0_13] : memref<1x128xf32, #tpu.memory_space<vmem>>, vector<1x128xf32>
    %17 = arith.truncf %14 : vector<256x128xf32> to vector<256x128xbf16>
    %cst_14 = arith.constant dense<0.000000e+00> : vector<256x128xf32>
    %18 = tpu.matmul %17, %15, %cst_14 {dimension_numbers = #tpu.dot_dimension_numbers<[1], [0], [0], [1], [0, 0, 1, 1], [], []>} : vector<256x128xbf16>, vector<128x128xbf16>, vector<256x128xf32> -> vector<256x128xf32>
    %19 = vector.broadcast %16 : vector<1x128xf32> to vector<256x128xf32>
    %20 = arith.addf %18, %19 : vector<256x128xf32>
    %c0_15 = arith.constant 0 : index
    %c0_16 = arith.constant 0 : index
    %21 = vector.load %arg8[%c0_15, %c0_16] : memref<256x128xf32, #tpu.memory_space<vmem>>, vector<256x128xf32>
    tpu.vector_store %arg8[%c0_15, %c0_16], %20 {strides = array<i32>} : memref<256x128xf32, #tpu.memory_space<vmem>>, vector<256x128xf32>,
    return
  }
  func.func @transform_0(%arg0: i32) -> (i32, i32) {
    %c0_i32 = arith.constant 0 : i32
    %c0_i32_0 = arith.constant 0 : i32
    return %arg0, %c0_i32 : i32, i32
  }
  func.func @transform_1(%arg0: i32) -> (i32, i32) {
    %c0_i32 = arith.constant 0 : i32
    %c0_i32_0 = arith.constant 0 : i32
    %c0_i32_1 = arith.constant 0 : i32
    return %c0_i32, %c0_i32_0 : i32, i32
  }
  func.func @transform_2(%arg0: i32) -> (i32, i32) {
    %c0_i32 = arith.constant 0 : i32
    %c0_i32_0 = arith.constant 0 : i32
    %c0_i32_1 = arith.constant 0 : i32
    return %c0_i32, %c0_i32_0 : i32, i32
  }
  func.func @transform_3(%arg0: i32) -> (i32, i32) {
    %c0_i32 = arith.constant 0 : i32
    %c0_i32_0 = arith.constant 0 : i32
    %c0_i32_1 = arith.constant 0 : i32
    return %c0_i32, %c0_i32_0 : i32, i32
  }
  func.func @transform_4(%arg0: i32) -> (i32, i32) {
    %c0_i32 = arith.constant 0 : i32
    %c0_i32_0 = arith.constant 0 : i32
    %c0_i32_1 = arith.constant 0 : i32
    return %c0_i32, %c0_i32_0 : i32, i32
  }
  func.func @transform_5(%arg0: i32) -> (i32, i32) {
    %c0_i32 = arith.constant 0 : i32
    %c0_i32_0 = arith.constant 0 : i32
    %c0_i32_1 = arith.constant 0 : i32
    return %c0_i32, %c0_i32_0 : i32, i32
  }
  func.func @transform_6(%arg0: i32) -> (i32, i32) {
    %c0_i32 = arith.constant 0 : i32
    %c0_i32_0 = arith.constant 0 : i32
    %c0_i32_1 = arith.constant 0 : i32
    return %c0_i32, %c0_i32_0 : i32, i32
  }
  func.func @transform_7(%arg0: i32) -> (i32, i32) {
    %c0_i32 = arith.constant 0 : i32
    %c0_i32_0 = arith.constant 0 : i32
    return %arg0, %c0_i32 : i32, i32
  }
}

</mosaic_0001>

<bundles_post_ra>
// kernel: tpu_custom_call.1
= control target key start
LH: loop header
LB: loop body
LE: loop exit
PB: predicated region body
PF: predicated region fallthrough
CT: control target
= control target key end

     0   :  { %12 = vsyncpa [#allocation3], 0  ;;  %s2150_s0 = inlined_call_operand.vmem [shape: f32[512,32], index: 0, kind: input, shape index: {}]   ;;  %s2151_s1 = inlined_call_operand.vmem [shape: bf16[32,128], index: 1, kind: input, shape index: {}]   ;;  %s2152_s2 = inlined_call_operand.vmem [shape: f32[1,128], index: 2, kind: input, shape index: {}]   ;;  %s2153_s3 = inlined_call_operand.vmem [shape: bf16[128,128], index: 3, kind: input, shape index: {}]   ;;  %s2154_s4 = inlined_call_operand.vmem [shape: f32[1,128], index: 4, kind: input, shape index: {}]   ;;  %s2155_s5 = inlined_call_operand.vmem [shape: bf16[128,128], index: 5, kind: input, shape index: {}]   ;;  %s2156_s6 = inlined_call_operand.vmem [shape: f32[1,128], index: 6, kind: input, shape index: {}]   ;;  %s2157_s7 = inlined_call_operand.hbm [shape: f32[512,128], index: 7, kind: output, shape index: {}]  }
   0x1   :  { %14 = vsyncpa [#allocation3 + $0x1], 0  ;;  %s1776_s24 = smov 0   ;;  %s1778_s25 = smov 0  }
   0x2   :  { %s1780_s26 = smov 0   ;;  %s1782_s27 = smov 0  }
   0x3 LB: > { %s1797_s28 = sadd.s32 4294967295, %s1731_s27   ;;  %s1230_s29 = sadd.s32 4294967294, %s1731_s27   ;;  %s1731_s27 = sphi %s1782_s27, %s2163_s27   ;;  %s1727_s26 = sphi %s1780_s26, %s2162_s26   ;;  %s1723_s25 = sphi %s1778_s25, %s2161_s25   ;;  %s1719_s24 = sphi %s1776_s24, %s2160_s24  }
   0x4   : > { %s1801_s30 = sadd.s32 1, %s1731_s27   ;;  %s179_s8 = sadd.s32 1, %s1727_s26 }
   0x5   : > { %s176_s9 = ssub.s32 %s1731_s27, %s1801_s30  ;;  %p189_p0 = scmp.ne.s32.totalorder %s1727_s26, %s1723_s25 }
   0x6   : > { %p177_p1 = scmp.eq.s32.totalorder %s176_s9, 0  ;;  %p190_p2 = scmp.eq.s32.totalorder %s1797_s28, 1 }
   0x7   : > { %p195_p3 = scmp.ne.s32.totalorder %s1723_s25, %s1719_s24  ;;  %p196_p4 = scmp.eq.s32.totalorder %s1230_s29, 1 }
   0x8   : > { %s1812_s10 = scalar_select %p177_p1, %s1727_s26, %s179_s8  }
   0x9   : > { %p1814_p5 = por %p190_p2, %p189_p0  ;;  %p1818_p6 = por %p196_p4, %p195_p3 }
   0xa   : > { %p1233_p7 = scmp.ge.s32.totalorder %s1731_s27, 1  ;;  %p241_p8 = scmp.lt.s32.totalorder %s1731_s27, 3 }
   0xc   : > { %p242_p9 = pnand %p1233_p7, %p241_p8 }
   0xd   : > { %v1523_v0 = vld [vmem:[%s2151_s1] sm:$0xff] (!%p242_p9)   ;;  %s1235_s15 = sshll.u32 (!%p242_p9), %s1797_s28, 5  ;;  %v1524_v1 = vld [vmem:[%s2151_s1 + $0x8] sm:$0xff] (!%p242_p9)   ;;  %vm352_vm0 = vcmask (!%p242_p9), 261120   ;;  %v1527_v30 = vld [vmem:[%s2153_s3 + $0x10] sm:$0xff] (!%p242_p9)   ;;  %s270_s16 = sand.u32 (!%p242_p9), 1, %s1723_s25  }
   0xe   : > { %245 = sbr.rel (%p242_p9) target bundleno = 778 (0x30a), region = 48  ;;  %p274_p10 = scmp.lt.s32.totalorder (!%p242_p9), %s1235_s15, 63  ;;  %1346 = vmatprep.subr.bf16.mxu0 (!%p242_p9), %v1523_v0  ;;  %1478 = vmatprep.subr.bf16.mxu1 (!%p242_p9), %v1523_v0  ;;  %v1525_v2 = vld [vmem:[%s2153_s3] sm:$0xff] (!%p242_p9)   ;;  %v1526_v24 = vld [vmem:[%s2153_s3 + $0x8] sm:$0xff] (!%p242_p9)   ;;  %v1528_v38 = vld [vmem:[%s2153_s3 + $0x18] sm:$0xff] (!%p242_p9)  }
   0xf   : > { %1347 = vmatpush3.bf16.msra.mxu0 (!%p242_p9), %v1523_v0  ;;  %1480 = vmatpush3.bf16.msra.mxu1 (!%p242_p9), %v1523_v0  ;;  %v1529_v54 = vld [vmem:[%s2153_s3 + $0x20] sm:$0xff] (!%p242_p9)   ;;  %v1530_v55 = vld [vmem:[%s2153_s3 + $0x28] sm:$0xff] (!%p242_p9)   ;;  %v1531_v56 = vld [vmem:[%s2153_s3 + $0x30] sm:$0xff] (!%p242_p9)   ;;  %s1234_s17 = sshll.u32 (!%p242_p9), %s270_s16, 8  ;;  %s1279_s21 = sshll.u32 (!%p242_p9), %s1797_s28, 12 }
  0x10   : > { %1348 = vmatprep.subr.bf16.mxu0 (!%p242_p9), %v1524_v1  ;;  %1479 = vmatprep.subr.bf16.mxu1 (!%p242_p9), %v1524_v1  ;;  %v1532_v57 = vld [vmem:[%s2153_s3 + $0x38] sm:$0xff] (!%p242_p9)   ;;  %v1533_v58 = vld [vmem:[%s2155_s5] sm:$0xff] (!%p242_p9)   ;;  %v1534_v59 = vld [vmem:[%s2155_s5 + $0x8] sm:$0xff] (!%p242_p9)   ;;  %s2099_s8 = scalar_lea.hbm (!%p242_p9), %s2157_s7, %s1279_s21  ;;  %s2109_s28 = scalar_lea.sflag (!%p242_p9), [#allocation3], %s270_s16 }
  0x11   : > { %v1535_v60 = vld [vmem:[%s2155_s5 + $0x10] sm:$0xff] (!%p242_p9)   ;;  %v1536_v61 = vld [vmem:[%s2155_s5 + $0x18] sm:$0xff] (!%p242_p9)   ;;  %v1923_v62 = vld [vmem:[%s2152_s2] ss:$0 sm:$0xff] (!%p242_p9)  ;;  %s1733_s13 = smov (!%p242_p9), [#allocation2]  }
  0x12   : > { %s1673_s14 = sshll.u32 (!%p242_p9), %s1733_s13, 4  ;;  %s1674_s14 = int_to_ptr.vmem [resolvable:$false] %s1673_s14 }
  0x13   : > { %1349 = vmatpush3.bf16.msra.mxu0 (!%p242_p9), %v1524_v1  ;;  %1481 = vmatpush3.bf16.msra.mxu1 (!%p242_p9), %v1524_v1 }
  0x14   : > { %1382 = vmatprep.subr.bf16.mxu1 (!%p242_p9), %v1525_v2  ;;  %1430 = vmatprep.subr.bf16.mxu0 (!%p242_p9), %v1533_v58 }
  0x15   : > { %s2165_s15 = smov (!%p274_p10, %s1235_s15), 63 }
  0x16   : > { %s1236_s20 = sshll.u32 %s2165_s15, 3  ;;  %s1675_s15 = scalar_lea.vmem %s1674_s14, 8192 }
  0x17   : > { %s1837_s23 = scalar_lea.vmem %s2150_s0, %s1236_s20  ;;  %s2034_s20 = scalar_lea.vmem [#allocation2], %s1234_s17 }
  0x18   : > { %v281_v3 = vld [vmem:[%s1837_s23] sm:$0xff]  ;;  %v282_v4 = vld [vmem:[%s1837_s23 + $0x8] sm:$0xff]  ;;  %v283_v5 = vld [vmem:[%s1837_s23 + $0x10] sm:$0xff]  ;;  %s1168_s22 = sshll.u32 %s2034_s20, 4  ;;  %s2101_s22 = int_to_ptr.vmem [resolvable:$true] %s1168_s22 }
  0x19   : > { %v318_v6 = vpack.c.bf16 %v282_v4, %v281_v3  ;;  %v284_v7 = vld [vmem:[%s1837_s23 + $0x18] sm:$0xff]  ;;  %v285_v8 = vld [vmem:[%s1837_s23 + $0x20] sm:$0xff]  ;;  %v286_v9 = vld [vmem:[%s1837_s23 + $0x28] sm:$0xff]  ;;  %s1669_s9 = scalar_lea.vmem %s2101_s22, 4096  ;;  %p1676_p0 = scmp.lt.s32.totalorder %s2101_s22, %s1674_s14 }
  0x1a   : > { %v319_v10 = vpack.c.bf16 %v284_v7, %v283_v5  ;;  %v320_v11 = vpack.c.bf16 %v286_v9, %v285_v8  ;;  %v287_v12 = vld [vmem:[%s1837_s23 + $0x30] sm:$0xff]  ;;  %v288_v13 = vld [vmem:[%s1837_s23 + $0x38] sm:$0xff]  ;;  %v289_v14 = vld [vmem:[%s1837_s23 + $0x40] sm:$0xff]  ;;  %p1670_p11 = scmp.ne.s32.totalorder %s2101_s22, %s1669_s9  ;;  %p1677_p1 = scmp.lt.s32.totalorder %s1675_s15, %s1669_s9 }
  0x1b   : > { %1350 = vmatprep.mubr.msk.bf16.mxu0 %vm352_vm0, %v318_v6  ;;  %v290_v15 = vld [vmem:[%s1837_s23 + $0x48] sm:$0xff]  ;;  %v297_v16 = vld [vmem:[%s1837_s23 + $0x80] sm:$0xff]  ;;  %v299_v19 = vld [vmem:[%s1837_s23 + $0x90] sm:$0xff]  ;;  %v321_v25 = vpack.c.bf16 %v288_v13, %v287_v12 }
  0x1c   : > { %1351 = vmatmul.mubr.msk.bf16.vlgmr.msra.gmra.mrb[0].mxu0 %vm352_vm0, %v319_v10  ;;  %v298_v17 = vld [vmem:[%s1837_s23 + $0x88] sm:$0xff]  ;;  %v300_v20 = vld [vmem:[%s1837_s23 + $0x98] sm:$0xff]  ;;  %v301_v21 = vld [vmem:[%s1837_s23 + $0xa0] sm:$0xff]  ;;  %v322_v27 = vpack.c.bf16 %v290_v15, %v289_v14  ;;  %p1671_p12 = pnand %p1670_p11, %p1814_p5  ;;  %p1678_p2 = por %p1677_p1, %p1676_p0 }
  0x1d   : > { %1354 = vmatprep.mubr.msk.bf16.mxu0 %vm352_vm0, %v320_v11  ;;  %v326_v18 = vpack.c.bf16 %v298_v17, %v297_v16  ;;  %v327_v22 = vpack.c.bf16 %v300_v20, %v299_v19  ;;  %v302_v23 = vld [vmem:[%s1837_s23 + $0xa8] sm:$0xff]  ;;  %v303_v28 = vld [vmem:[%s1837_s23 + $0xb0] sm:$0xff]  ;;  %v304_v29 = vld [vmem:[%s1837_s23 + $0xb8] sm:$0xff]  ;;  %1431 = vmatpush3.bf16.msra.mxu0 %v1533_v58 }
  0x1e   : > { %v328_v26 = vpack.c.bf16 %v302_v23, %v301_v21  ;;  %v305_v31 = vld [vmem:[%s1837_s23 + $0xc0] sm:$0xff]  ;;  %v306_v32 = vld [vmem:[%s1837_s23 + $0xc8] sm:$0xff]  ;;  %v291_v33 = vld [vmem:[%s1837_s23 + $0x50] sm:$0xff]  ;;  %v329_v37 = vpack.c.bf16 %v304_v29, %v303_v28  ;;  %1432 = vmatprep.subr.bf16.mxu0 %v1534_v59  ;;  %p1672_p13 = pneg %p1671_p12 }
  0x1f   : > { %1366 = vmatprep.mubr.msk.bf16.mxu1 %vm352_vm0, %v326_v18  ;;  %v292_v34 = vld [vmem:[%s1837_s23 + $0x58] sm:$0xff]  ;;  %v293_v35 = vld [vmem:[%s1837_s23 + $0x60] sm:$0xff]  ;;  %v294_v36 = vld [vmem:[%s1837_s23 + $0x68] sm:$0xff]  ;;  %v330_v39 = vpack.c.bf16 %v306_v32, %v305_v31 }
  0x20   : > { %1367 = vmatmul.mubr.msk.bf16.vlgmr.msra.gmra.mrb[0].mxu1 %vm352_vm0, %v327_v22  ;;  %v323_v40 = vpack.c.bf16 %v292_v34, %v291_v33  ;;  %v324_v41 = vpack.c.bf16 %v294_v36, %v293_v35  ;;  %v307_v42 = vld [vmem:[%s1837_s23 + $0xd0] sm:$0xff]  ;;  %v308_v43 = vld [vmem:[%s1837_s23 + $0xd8] sm:$0xff]  ;;  %v309_v44 = vld [vmem:[%s1837_s23 + $0xe0] sm:$0xff]  ;;  %p1679_p3 = pnand %p1678_p2, %p1672_p13 }
  0x21   : > { %1370 = vmatprep.mubr.msk.bf16.mxu1 %vm352_vm0, %v328_v26  ;;  %1383 = vmatpush3.bf16.msra.mxu1 %v1525_v2  ;;  %v310_v45 = vld [vmem:[%s1837_s23 + $0xe8] sm:$0xff]  ;;  %v295_v46 = vld [vmem:[%s1837_s23 + $0x70] sm:$0xff]  ;;  %v296_v47 = vld [vmem:[%s1837_s23 + $0x78] sm:$0xff]  ;;  %v331_v48 = vpack.c.bf16 %v308_v43, %v307_v42 }
  0x22   : > { %1384 = vmatprep.subr.bf16.mxu1 %v1526_v24  ;;  %v332_v49 = vpack.c.bf16 %v310_v45, %v309_v44  ;;  %v325_v50 = vpack.c.bf16 %v296_v47, %v295_v46  ;;  %v311_v51 = vld [vmem:[%s1837_s23 + $0xf0] sm:$0xff]  ;;  %v312_v52 = vld [vmem:[%s1837_s23 + $0xf8] sm:$0xff]  ;;  %1433 = vmatpush3.bf16.msra.mxu0 %v1534_v59 }
  0x23   : > { %v333_v53 = vpack.c.bf16 %v312_v52, %v311_v51  ;;  %1434 = vmatprep.subr.bf16.mxu0 %v1535_v60 }
  0x24   : > { %1355 = vmatmul.mubr.msk.bf16.gmra.mrb[4].mxu0 %vm352_vm0, %v321_v25 }
  0x25   : > { %1358 = vmatprep.mubr.msk.bf16.mxu0 %vm352_vm0, %v322_v27  ;;  %1385 = vmatpush3.bf16.msra.mxu1 %v1526_v24 }
  0x26   : > { %1386 = vmatprep.subr.bf16.mxu1 %v1527_v30  ;;  %1435 = vmatpush3.bf16.msra.mxu0 %v1535_v60 }
  0x27   : > { %1436 = vmatprep.subr.bf16.mxu0 %v1536_v61 }
  0x28   : > { %1371 = vmatmul.mubr.msk.bf16.gmra.mrb[4].mxu1 %vm352_vm0, %v329_v37 }
  0x29   : > { %1374 = vmatprep.mubr.msk.bf16.mxu1 %vm352_vm0, %v330_v39  ;;  %1387 = vmatpush3.bf16.msra.mxu1 %v1527_v30 }
  0x2a   : > { %1388 = vmatprep.subr.bf16.mxu1 %v1528_v38  ;;  %1437 = vmatpush3.bf16.msra.mxu0 %v1536_v61 }
  0x2c   : > { %1359 = vmatmul.mubr.msk.bf16.gmra.mrb[8].mxu0 %vm352_vm0, %v323_v40 }
  0x2d   : > { %1362 = vmatprep.mubr.msk.bf16.mxu0 %vm352_vm0, %v324_v41  ;;  %1389 = vmatpush3.bf16.msra.mxu1 %v1528_v38 }
  0x2e   : > { %1390 = vmatprep.subr.bf16.mxu1 %v1529_v54 }
  0x30   : > { %1375 = vmatmul.mubr.msk.bf16.gmra.mrb[8].mxu1 %vm352_vm0, %v331_v48 }
  0x31   : > { %1378 = vmatprep.mubr.msk.bf16.mxu1 %vm352_vm0, %v332_v49  ;;  %1391 = vmatpush3.bf16.msra.mxu1 %v1529_v54 }
  0x32   : > { %1392 = vmatprep.subr.bf16.mxu1 %v1530_v55 }
  0x34   : > { %1363 = vmatmul.mubr.msk.bf16.gmra.mrb[12].mxu0 %vm352_vm0, %v325_v50 }
  0x35   : > { %1393 = vmatpush3.bf16.msra.mxu1 %v1530_v55 }
  0x36   : > { %1394 = vmatprep.subr.bf16.mxu1 %v1531_v56 }
  0x38   : > { %1379 = vmatmul.mubr.msk.bf16.gmra.mrb[12].mxu1 %vm352_vm0, %v333_v53 }
  0x39   : > { %1395 = vmatpush3.bf16.msra.mxu1 %v1531_v56 }
  0x3a   : > { %1396 = vmatprep.subr.bf16.mxu1 %v1532_v57 }
  0x3d   : > { %1397 = vmatpush3.bf16.msra.mxu1 %v1532_v57 }
  0xef   : > { %v1352_v63 = vpop.f32.mrb[0].mxu0 }
  0xf0   : > { %v444_v0 = vadd.f32 %v1352_v63, %v1923_v62  ;;  %v435_v1 = vpop.f32.mrb[1].mxu0 }
  0xf1   : > { %v436_v2 = vadd.f32 %v1923_v62, %v435_v1  ;;  %v1353_v3 = vpop.f32.mrb[2].mxu0 }
  0xf2   : > { %1541 = vtanh.f32 %v444_v0  ;;  %v447_v4 = vadd.f32 %v1353_v3, %v1923_v62  ;;  %v438_v5 = vpop.f32.mrb[3].mxu0 }
  0xf3   : > { %1543 = vtanh.f32 %v436_v2  ;;  %v439_v6 = vadd.f32 %v1923_v62, %v438_v5  ;;  %v1368_v7 = vpop.f32.mrb[0].mxu1 }
  0xf4   : > { %1545 = vtanh.f32 %v447_v4  ;;  %v508_v8 = vadd.f32 %v1368_v7, %v1923_v62  ;;  %v499_v9 = vpop.f32.mrb[1].mxu1 }
  0xf5   : > { %1547 = vtanh.f32 %v439_v6  ;;  %v500_v10 = vadd.f32 %v1923_v62, %v499_v9  ;;  %v1369_v11 = vpop.f32.mrb[2].mxu1 }
  0xf6   : > { %1549 = vtanh.f32 %v508_v8  ;;  %v511_v13 = vadd.f32 %v1369_v11, %v1923_v62  ;;  %v502_v14 = vpop.f32.mrb[3].mxu1 }
  0xf7   : > { %v1356_v12 = vpop.f32.mrb[4].mxu0  ;;  %1551 = vtanh.f32 %v500_v10  ;;  %v503_v21 = vadd.f32 %v1923_v62, %v502_v14 }
  0xf8   : > { %v460_v15 = vadd.f32 %v1356_v12, %v1923_v62  ;;  %v451_v16 = vpop.f32.mrb[5].mxu0  ;;  %1553 = vtanh.f32 %v511_v13 }
  0xf9   : > { %v452_v17 = vadd.f32 %v1923_v62, %v451_v16  ;;  %v1357_v18 = vpop.f32.mrb[6].mxu0 }
  0xfa   : > { %1555 = vtanh.f32 %v460_v15  ;;  %v463_v19 = vadd.f32 %v1357_v18, %v1923_v62  ;;  %v454_v20 = vpop.f32.mrb[7].mxu0 }
  0xfb   : > { %1557 = vtanh.f32 %v452_v17  ;;  %v455_v22 = vadd.f32 %v1923_v62, %v454_v20  ;;  %v1372_v24 = vpop.f32.mrb[4].mxu1 }
  0xfc   : > { %v1542_v23 = vpop.eup %1541  ;;  %1559 = vtanh.f32 %v463_v19  ;;  %v524_v26 = vadd.f32 %v1372_v24, %v1923_v62  ;;  %v515_v27 = vpop.f32.mrb[5].mxu1 }
  0xfd   : > { %v1544_v25 = vpop.eup %1543  ;;  %1561 = vtanh.f32 %v455_v22  ;;  %v516_v29 = vadd.f32 %v1923_v62, %v515_v27  ;;  %v1373_v30 = vpop.f32.mrb[6].mxu1 }
  0xfe   : > { %v1546_v28 = vpop.eup %1545  ;;  %1563 = vtanh.f32 %v503_v21  ;;  %v527_v34 = vadd.f32 %v1373_v30, %v1923_v62  ;;  %v518_v35 = vpop.f32.mrb[7].mxu1 }
  0xff   : > { %v1548_v31 = vpop.eup %1547  ;;  %v1360_v32 = vpop.f32.mrb[8].mxu0  ;;  %v612_v33 = vpack.c.bf16 %v1546_v28, %v1542_v23  ;;  %1565 = vtanh.f32 %v524_v26  ;;  %v519_v45 = vadd.f32 %v1923_v62, %v518_v35 }
 0x100   : > { %v476_v36 = vadd.f32 %v1360_v32, %v1923_v62  ;;  %v467_v37 = vpop.f32.mrb[9].mxu0  ;;  %v611_v38 = vpack.c.bf16 %v1548_v31, %v1544_v25  ;;  %1567 = vtanh.f32 %v516_v29  ;;  %v1941_v39 = vpop.eup %1549 }
 0x101   : > { %v468_v40 = vadd.f32 %v1923_v62, %v467_v37  ;;  %v1361_v41 = vpop.f32.mrb[10].mxu0  ;;  %1569 = vtanh.f32 %v527_v34  ;;  %v1944_v42 = vpop.eup %1551 }
 0x102   : > { %1571 = vtanh.f32 %v476_v36  ;;  %v479_v43 = vadd.f32 %v1361_v41, %v1923_v62  ;;  %v470_v44 = vpop.f32.mrb[11].mxu0  ;;  %1398 = vmatprep.mubr.bf16.mxu1 %v611_v38  ;;  %v1948_v46 = vpop.eup %1553 }
 0x103   : > { %1573 = vtanh.f32 %v468_v40  ;;  %v471_v47 = vadd.f32 %v1923_v62, %v470_v44  ;;  %1399 = vmatmul.mubr.bf16.vlgmr.msra.gmra.mrb[16].mxu1 %v612_v33  ;;  %v1376_v49 = vpop.f32.mrb[8].mxu1  ;;  %v620_v50 = vpack.c.bf16 %v1948_v46, %v1941_v39  ;;  %v1539_v39 = vld [vmem:[%s2155_s5 + $0x30] sm:$0xff]   ;;  %v1540_v46 = vld [vmem:[%s2155_s5 + $0x38] sm:$0xff]  }
 0x104   : > { %v1556_v48 = vpop.eup %1555  ;;  %1575 = vtanh.f32 %v479_v43  ;;  %v540_v52 = vadd.f32 %v1376_v49, %v1923_v62  ;;  %v531_v53 = vpop.f32.mrb[9].mxu1  ;;  %v1537_v49 = vld [vmem:[%s2155_s5 + $0x20] sm:$0xff]  }
 0x105   : > { %v1558_v51 = vpop.eup %1557  ;;  %1577 = vtanh.f32 %v471_v47  ;;  %v532_v55 = vadd.f32 %v1923_v62, %v531_v53  ;;  %v1377_v56 = vpop.f32.mrb[10].mxu1  ;;  %1438 = vmatprep.subr.bf16.mxu0 %v1537_v49 }
 0x106   : > { %v1560_v54 = vpop.eup %1559  ;;  %1579 = vtanh.f32 %v519_v45  ;;  %v543_v60 = vadd.f32 %v1377_v56, %v1923_v62  ;;  %v534_v61 = vpop.f32.mrb[11].mxu1  ;;  %1439 = vmatpush3.bf16.msra.mxu0 %v1537_v49 }
 0x107   : > { %v1562_v57 = vpop.eup %1561  ;;  %v1364_v58 = vpop.f32.mrb[12].mxu0  ;;  %v614_v59 = vpack.c.bf16 %v1560_v54, %v1556_v48  ;;  %1581 = vtanh.f32 %v540_v52  ;;  %v535_v10 = vadd.f32 %v1923_v62, %v534_v61 }
 0x108   : > { %v1956_v63 = vpop.eup %1563  ;;  %v492_v0 = vadd.f32 %v1364_v58, %v1923_v62  ;;  %v483_v1 = vpop.f32.mrb[13].mxu0  ;;  %v613_v2 = vpack.c.bf16 %v1562_v57, %v1558_v51  ;;  %1583 = vtanh.f32 %v532_v55  ;;  %v1538_v51 = vld [vmem:[%s2155_s5 + $0x28] sm:$0xff]  }
 0x109   : > { %v1959_v3 = vpop.eup %1565  ;;  %v484_v4 = vadd.f32 %v1923_v62, %v483_v1  ;;  %v1365_v5 = vpop.f32.mrb[14].mxu0  ;;  %1585 = vtanh.f32 %v543_v60  ;;  %v619_v6 = vpack.c.bf16 %v1956_v63, %v1944_v42  ;;  %1440 = vmatprep.subr.bf16.mxu0 %v1538_v51 }
 0x10a   : > { %v1568_v7 = vpop.eup %1567  ;;  %1587 = vtanh.f32 %v492_v0  ;;  %v495_v8 = vadd.f32 %v1365_v5, %v1923_v62  ;;  %v486_v9 = vpop.f32.mrb[15].mxu0  ;;  %1402 = vmatprep.mubr.bf16.mxu1 %v613_v2  ;;  %1441 = vmatpush3.bf16.msra.mxu0 %v1538_v51 }
 0x10b   : > { %v1570_v11 = vpop.eup %1569  ;;  %1589 = vtanh.f32 %v484_v4  ;;  %v487_v12 = vadd.f32 %v1923_v62, %v486_v9  ;;  %1403 = vmatmul.mubr.bf16.gmra.mrb[20].mxu1 %v614_v59  ;;  %v1380_v14 = vpop.f32.mrb[12].mxu1  ;;  %1442 = vmatprep.subr.bf16.mxu0 %v1539_v39 }
 0x10c   : > { %v1572_v13 = vpop.eup %1571  ;;  %1591 = vtanh.f32 %v495_v8  ;;  %v622_v15 = vpack.c.bf16 %v1570_v11, %v1959_v3  ;;  %v556_v17 = vadd.f32 %v1380_v14, %v1923_v62  ;;  %v547_v18 = vpop.f32.mrb[13].mxu1 }
 0x10d   : > { %v1574_v16 = vpop.eup %1573  ;;  %1593 = vtanh.f32 %v487_v12  ;;  %v548_v20 = vadd.f32 %v1923_v62, %v547_v18  ;;  %v1381_v21 = vpop.f32.mrb[14].mxu1 }
 0x10e   : > { %v1576_v19 = vpop.eup %1575  ;;  %1595 = vtanh.f32 %v535_v10  ;;  %v559_v24 = vadd.f32 %v1381_v21, %v1923_v62  ;;  %v550_v25 = vpop.f32.mrb[15].mxu1  ;;  %1443 = vmatpush3.bf16.msra.mxu0 %v1539_v39 }
 0x10f   : > { %v1578_v22 = vpop.eup %1577  ;;  %v616_v23 = vpack.c.bf16 %v1576_v19, %v1572_v13  ;;  %1597 = vtanh.f32 %v556_v17  ;;  %v551_v28 = vadd.f32 %v1923_v62, %v550_v25  ;;  %1444 = vmatprep.subr.bf16.mxu0 %v1540_v46 }
 0x110   : > { %v1580_v26 = vpop.eup %1579  ;;  %v615_v27 = vpack.c.bf16 %v1578_v22, %v1574_v16  ;;  %1599 = vtanh.f32 %v548_v20 }
 0x111   : > { %v1582_v29 = vpop.eup %1581  ;;  %1601 = vtanh.f32 %v559_v24  ;;  %v621_v30 = vpack.c.bf16 %v1580_v26, %v1568_v7 }
 0x112   : > { %v1584_v31 = vpop.eup %1583  ;;  %1406 = vmatprep.mubr.bf16.mxu1 %v615_v27  ;;  %1603 = vtanh.f32 %v551_v28  ;;  %1445 = vmatpush3.bf16.msra.mxu0 %v1540_v46 }
 0x113   : > { %v1586_v32 = vpop.eup %1585  ;;  %1407 = vmatmul.mubr.bf16.gmra.mrb[24].mxu1 %v616_v23 }
 0x114   : > { %v1588_v33 = vpop.eup %1587  ;;  %v624_v34 = vpack.c.bf16 %v1586_v32, %v1582_v29 }
 0x115   : > { %v1590_v35 = vpop.eup %1589 }
 0x116   : > { %v1592_v36 = vpop.eup %1591 }
 0x117   : > { %v1594_v37 = vpop.eup %1593  ;;  %v618_v38 = vpack.c.bf16 %v1592_v36, %v1588_v33 }
 0x118   : > { %v1596_v40 = vpop.eup %1595  ;;  %v617_v41 = vpack.c.bf16 %v1594_v37, %v1590_v35 }
 0x119   : > { %v1598_v42 = vpop.eup %1597  ;;  %v623_v43 = vpack.c.bf16 %v1596_v40, %v1584_v31 }
 0x11a   : > { %v1600_v44 = vpop.eup %1599  ;;  %1410 = vmatprep.mubr.bf16.mxu1 %v617_v41 }
 0x11b   : > { %v1602_v62 = vpop.eup %1601  ;;  %1411 = vmatmul.mubr.bf16.gmra.mrb[28].mxu1 %v618_v38 }
 0x11c   : > { %v1604_v45 = vpop.eup %1603  ;;  %1414 = vmatprep.mubr.bf16.mxu1 %v619_v6  ;;  %v626_v47 = vpack.c.bf16 %v1602_v62, %v1598_v42 }
 0x11d   : > { %v625_v48 = vpack.c.bf16 %v1604_v45, %v1600_v44 }
 0x123   : > { %1415 = vmatmul.mubr.bf16.gmra.mrb[32].mxu1 %v620_v50  ;;  %v1990_v50 = vld [vmem:[%s2154_s4] ss:$0 sm:$0xff] }
 0x124   : > { %1418 = vmatprep.mubr.bf16.mxu1 %v621_v30 }
 0x12b   : > { %1419 = vmatmul.mubr.bf16.gmra.mrb[36].mxu1 %v622_v15 }
 0x12c   : > { %1422 = vmatprep.mubr.bf16.mxu1 %v623_v43 }
 0x133   : > { %1423 = vmatmul.mubr.bf16.gmra.mrb[40].mxu1 %v624_v34 }
 0x134   : > { %1426 = vmatprep.mubr.bf16.mxu1 %v625_v48 }
 0x13b   : > { %1427 = vmatmul.mubr.bf16.gmra.mrb[44].mxu1 %v626_v47 }
 0x1d6   : > { %v1400_v52 = vpop.f32.mrb[16].mxu1 }
 0x1d7   : > { %v724_v53 = vadd.f32 %v1400_v52, %v1990_v50  ;;  %v715_v54 = vpop.f32.mrb[17].mxu1 }
 0x1d8   : > { %v716_v55 = vadd.f32 %v1990_v50, %v715_v54  ;;  %v1401_v56 = vpop.f32.mrb[18].mxu1 }
 0x1d9   : > { %1605 = vtanh.f32 %v724_v53  ;;  %v727_v57 = vadd.f32 %v1401_v56, %v1990_v50  ;;  %v718_v58 = vpop.f32.mrb[19].mxu1 }
 0x1da   : > { %1607 = vtanh.f32 %v716_v55  ;;  %v719_v59 = vadd.f32 %v1990_v50, %v718_v58 }
 0x1db   : > { %1609 = vtanh.f32 %v727_v57 }
 0x1dc   : > { %1611 = vtanh.f32 %v719_v59 }
 0x1de   : > { %v1404_v60 = vpop.f32.mrb[20].mxu1 }
 0x1df   : > { %v740_v61 = vadd.f32 %v1404_v60, %v1990_v50  ;;  %v731_v63 = vpop.f32.mrb[21].mxu1 }
 0x1e0   : > { %v732_v0 = vadd.f32 %v1990_v50, %v731_v63  ;;  %v1405_v1 = vpop.f32.mrb[22].mxu1 }
 0x1e1   : > { %1613 = vtanh.f32 %v740_v61  ;;  %v743_v2 = vadd.f32 %v1405_v1, %v1990_v50  ;;  %v734_v3 = vpop.f32.mrb[23].mxu1 }
 0x1e2   : > { %1615 = vtanh.f32 %v732_v0  ;;  %v735_v4 = vadd.f32 %v1990_v50, %v734_v3 }
 0x1e3   : > { %v1606_v5 = vpop.eup %1605  ;;  %1617 = vtanh.f32 %v743_v2 }
 0x1e4   : > { %v1608_v6 = vpop.eup %1607  ;;  %1619 = vtanh.f32 %v735_v4 }
 0x1e5   : > { %v1610_v7 = vpop.eup %1609 }
 0x1e6   : > { %v1612_v8 = vpop.eup %1611  ;;  %v1408_v9 = vpop.f32.mrb[24].mxu1  ;;  %v892_v10 = vpack.c.bf16 %v1610_v7, %v1606_v5 }
 0x1e7   : > { %v756_v11 = vadd.f32 %v1408_v9, %v1990_v50  ;;  %v747_v12 = vpop.f32.mrb[25].mxu1  ;;  %v891_v13 = vpack.c.bf16 %v1612_v8, %v1608_v6 }
 0x1e8   : > { %v748_v14 = vadd.f32 %v1990_v50, %v747_v12  ;;  %v1409_v15 = vpop.f32.mrb[26].mxu1 }
 0x1e9   : > { %1621 = vtanh.f32 %v756_v11  ;;  %v759_v16 = vadd.f32 %v1409_v15, %v1990_v50  ;;  %v750_v17 = vpop.f32.mrb[27].mxu1  ;;  %1446 = vmatprep.mubr.bf16.mxu0 %v891_v13 }
 0x1ea   : > { %1623 = vtanh.f32 %v748_v14  ;;  %v751_v18 = vadd.f32 %v1990_v50, %v750_v17  ;;  %1447 = vmatmul.mubr.bf16.vlgmr.msra.gmra.mrb[16].mxu0 %v892_v10 }
 0x1eb   : > { %v1614_v19 = vpop.eup %1613  ;;  %1625 = vtanh.f32 %v759_v16 }
 0x1ec   : > { %v1616_v20 = vpop.eup %1615  ;;  %1627 = vtanh.f32 %v751_v18 }
 0x1ed   : > { %v1618_v21 = vpop.eup %1617 }
 0x1ee   : > { %v1620_v22 = vpop.eup %1619  ;;  %v1412_v23 = vpop.f32.mrb[28].mxu1  ;;  %v894_v24 = vpack.c.bf16 %v1618_v21, %v1614_v19 }
 0x1ef   : > { %v772_v25 = vadd.f32 %v1412_v23, %v1990_v50  ;;  %v763_v26 = vpop.f32.mrb[29].mxu1  ;;  %v893_v27 = vpack.c.bf16 %v1620_v22, %v1616_v20 }
 0x1f0   : > { %v764_v28 = vadd.f32 %v1990_v50, %v763_v26  ;;  %v1413_v29 = vpop.f32.mrb[30].mxu1 }
 0x1f1   : > { %1629 = vtanh.f32 %v772_v25  ;;  %v775_v30 = vadd.f32 %v1413_v29, %v1990_v50  ;;  %v766_v31 = vpop.f32.mrb[31].mxu1  ;;  %1450 = vmatprep.mubr.bf16.mxu0 %v893_v27 }
 0x1f2   : > { %1631 = vtanh.f32 %v764_v28  ;;  %v767_v32 = vadd.f32 %v1990_v50, %v766_v31  ;;  %1451 = vmatmul.mubr.bf16.gmra.mrb[20].mxu0 %v894_v24 }
 0x1f3   : > { %v1622_v33 = vpop.eup %1621  ;;  %1633 = vtanh.f32 %v775_v30 }
 0x1f4   : > { %v1624_v34 = vpop.eup %1623  ;;  %1635 = vtanh.f32 %v767_v32 }
 0x1f5   : > { %v1626_v35 = vpop.eup %1625 }
 0x1f6   : > { %v1628_v36 = vpop.eup %1627  ;;  %v1416_v37 = vpop.f32.mrb[32].mxu1  ;;  %v896_v38 = vpack.c.bf16 %v1626_v35, %v1622_v33 }
 0x1f7   : > { %v788_v40 = vadd.f32 %v1416_v37, %v1990_v50  ;;  %v779_v41 = vpop.f32.mrb[33].mxu1  ;;  %v895_v42 = vpack.c.bf16 %v1628_v36, %v1624_v34 }
 0x1f8   : > { %v780_v43 = vadd.f32 %v1990_v50, %v779_v41  ;;  %v1417_v44 = vpop.f32.mrb[34].mxu1 }
 0x1f9   : > { %1637 = vtanh.f32 %v788_v40  ;;  %v791_v62 = vadd.f32 %v1417_v44, %v1990_v50  ;;  %v782_v45 = vpop.f32.mrb[35].mxu1  ;;  %1454 = vmatprep.mubr.bf16.mxu0 %v895_v42 }
 0x1fa   : > { %1639 = vtanh.f32 %v780_v43  ;;  %v783_v47 = vadd.f32 %v1990_v50, %v782_v45  ;;  %1455 = vmatmul.mubr.bf16.gmra.mrb[24].mxu0 %v896_v38 }
 0x1fb   : > { %v1630_v48 = vpop.eup %1629  ;;  %1641 = vtanh.f32 %v791_v62 }
 0x1fc   : > { %v1632_v49 = vpop.eup %1631  ;;  %1643 = vtanh.f32 %v783_v47 }
 0x1fd   : > { %v1634_v51 = vpop.eup %1633 }
 0x1fe   : > { %v1636_v39 = vpop.eup %1635  ;;  %v1420_v46 = vpop.f32.mrb[36].mxu1  ;;  %v898_v52 = vpack.c.bf16 %v1634_v51, %v1630_v48 }
 0x1ff   : > { %v804_v53 = vadd.f32 %v1420_v46, %v1990_v50  ;;  %v795_v54 = vpop.f32.mrb[37].mxu1  ;;  %v897_v55 = vpack.c.bf16 %v1636_v39, %v1632_v49 }
 0x200   : > { %v796_v56 = vadd.f32 %v1990_v50, %v795_v54  ;;  %v1421_v57 = vpop.f32.mrb[38].mxu1 }
 0x201   : > { %1645 = vtanh.f32 %v804_v53  ;;  %v807_v58 = vadd.f32 %v1421_v57, %v1990_v50  ;;  %v798_v59 = vpop.f32.mrb[39].mxu1  ;;  %1458 = vmatprep.mubr.bf16.mxu0 %v897_v55 }
 0x202   : > { %1647 = vtanh.f32 %v796_v56  ;;  %v799_v60 = vadd.f32 %v1990_v50, %v798_v59  ;;  %1459 = vmatmul.mubr.bf16.gmra.mrb[28].mxu0 %v898_v52 }
 0x203   : > { %v1638_v61 = vpop.eup %1637  ;;  %1649 = vtanh.f32 %v807_v58 }
 0x204   : > { %v1640_v63 = vpop.eup %1639  ;;  %1651 = vtanh.f32 %v799_v60 }
 0x205   : > { %v1642_v0 = vpop.eup %1641 }
 0x206   : > { %v1644_v1 = vpop.eup %1643  ;;  %v1424_v2 = vpop.f32.mrb[40].mxu1  ;;  %v900_v3 = vpack.c.bf16 %v1642_v0, %v1638_v61 }
 0x207   : > { %v820_v4 = vadd.f32 %v1424_v2, %v1990_v50  ;;  %v811_v5 = vpop.f32.mrb[41].mxu1  ;;  %v899_v6 = vpack.c.bf16 %v1644_v1, %v1640_v63 }
 0x208   : > { %v812_v7 = vadd.f32 %v1990_v50, %v811_v5  ;;  %v1425_v8 = vpop.f32.mrb[42].mxu1 }
 0x209   : > { %1653 = vtanh.f32 %v820_v4  ;;  %v823_v9 = vadd.f32 %v1425_v8, %v1990_v50  ;;  %v814_v10 = vpop.f32.mrb[43].mxu1  ;;  %1462 = vmatprep.mubr.bf16.mxu0 %v899_v6 }
 0x20a   : > { %1655 = vtanh.f32 %v812_v7  ;;  %v815_v11 = vadd.f32 %v1990_v50, %v814_v10  ;;  %1463 = vmatmul.mubr.bf16.gmra.mrb[32].mxu0 %v900_v3 }
 0x20b   : > { %v1646_v12 = vpop.eup %1645  ;;  %1657 = vtanh.f32 %v823_v9 }
 0x20c   : > { %v1648_v13 = vpop.eup %1647  ;;  %1659 = vtanh.f32 %v815_v11 }
 0x20d   : > { %v1650_v14 = vpop.eup %1649 }
 0x20e   : > { %v1652_v15 = vpop.eup %1651  ;;  %v1428_v16 = vpop.f32.mrb[44].mxu1  ;;  %v902_v17 = vpack.c.bf16 %v1650_v14, %v1646_v12 }
 0x20f   : > { %v836_v18 = vadd.f32 %v1428_v16, %v1990_v50  ;;  %v827_v19 = vpop.f32.mrb[45].mxu1  ;;  %v901_v20 = vpack.c.bf16 %v1652_v15, %v1648_v13 }
 0x210   : > { %v828_v21 = vadd.f32 %v1990_v50, %v827_v19  ;;  %v1429_v22 = vpop.f32.mrb[46].mxu1 }
 0x211   : > { %1661 = vtanh.f32 %v836_v18  ;;  %v839_v23 = vadd.f32 %v1429_v22, %v1990_v50  ;;  %v830_v24 = vpop.f32.mrb[47].mxu1  ;;  %1466 = vmatprep.mubr.bf16.mxu0 %v901_v20 }
 0x212   : > { %1663 = vtanh.f32 %v828_v21  ;;  %v831_v25 = vadd.f32 %v1990_v50, %v830_v24  ;;  %1467 = vmatmul.mubr.bf16.gmra.mrb[36].mxu0 %v902_v17  ;;  %v2030_v50 = vld [vmem:[%s2156_s6] ss:$0 sm:$0xff] }
 0x213   : > { %v1654_v26 = vpop.eup %1653  ;;  %1665 = vtanh.f32 %v839_v23 }
 0x214   : > { %v1656_v27 = vpop.eup %1655  ;;  %1667 = vtanh.f32 %v831_v25 }
 0x215   : > { %v1658_v28 = vpop.eup %1657 }
 0x216   : > { %v1660_v29 = vpop.eup %1659  ;;  %v904_v30 = vpack.c.bf16 %v1658_v28, %v1654_v26 }
 0x217   : > { %v903_v31 = vpack.c.bf16 %v1660_v29, %v1656_v27 }
 0x219   : > { %1470 = vmatprep.mubr.bf16.mxu0 %v903_v31 }
 0x21a   : > { %1471 = vmatmul.mubr.bf16.gmra.mrb[40].mxu0 %v904_v30 }
 0x21b   : > { %v1662_v32 = vpop.eup %1661 }
 0x21c   : > { %v1664_v33 = vpop.eup %1663 }
 0x21d   : > { %v1666_v34 = vpop.eup %1665 }
 0x21e   : > { %v1668_v35 = vpop.eup %1667  ;;  %v906_v36 = vpack.c.bf16 %v1666_v34, %v1662_v32 }
 0x21f   : > { %v905_v37 = vpack.c.bf16 %v1668_v35, %v1664_v33 }
 0x221   : > { %1474 = vmatprep.mubr.bf16.mxu0 %v905_v37 }
 0x222   : > { %1475 = vmatmul.mubr.bf16.gmra.mrb[44].mxu0 %v906_v36 }
 0x2bd   : > { %v1448_v38 = vpop.f32.mrb[16].mxu0 }
 0x2be   : > { %v1004_v40 = vadd.f32 %v1448_v38, %v2030_v50  ;;  %v995_v41 = vpop.f32.mrb[17].mxu0 }
 0x2bf   : > { %v996_v42 = vadd.f32 %v2030_v50, %v995_v41  ;;  %v1449_v43 = vpop.f32.mrb[18].mxu0 }
 0x2c0   : > { %1124 = vst [vmem:[%s2034_s20 + $0x10] sm:$0xff] %v1004_v40  ;;  %v1007_v44 = vadd.f32 %v1449_v43, %v2030_v50  ;;  %v998_v62 = vpop.f32.mrb[19].mxu0 }
 0x2c1   : > { %1122 = vst [vmem:[%s2034_s20] sm:$0xff] %v996_v42  ;;  %v999_v45 = vadd.f32 %v2030_v50, %v998_v62 }
 0x2c2   : > { %1125 = vst [vmem:[%s2034_s20 + $0x18] sm:$0xff] %v1007_v44 }
 0x2c3   : > { %1123 = vst [vmem:[%s2034_s20 + $0x8] sm:$0xff] %v999_v45 }
 0x2c5   : > { %v1452_v47 = vpop.f32.mrb[20].mxu0 }
 0x2c6   : > { %v1020_v48 = vadd.f32 %v1452_v47, %v2030_v50  ;;  %v1011_v49 = vpop.f32.mrb[21].mxu0 }
 0x2c7   : > { %v1012_v51 = vadd.f32 %v2030_v50, %v1011_v49  ;;  %v1453_v39 = vpop.f32.mrb[22].mxu0 }
 0x2c8   : > { %1128 = vst [vmem:[%s2034_s20 + $0x30] sm:$0xff] %v1020_v48  ;;  %v1023_v46 = vadd.f32 %v1453_v39, %v2030_v50  ;;  %v1014_v52 = vpop.f32.mrb[23].mxu0 }
 0x2c9   : > { %1126 = vst [vmem:[%s2034_s20 + $0x20] sm:$0xff] %v1012_v51  ;;  %v1015_v53 = vadd.f32 %v2030_v50, %v1014_v52 }
 0x2ca   : > { %1129 = vst [vmem:[%s2034_s20 + $0x38] sm:$0xff] %v1023_v46 }
 0x2cb   : > { %1127 = vst [vmem:[%s2034_s20 + $0x28] sm:$0xff] %v1015_v53 }
 0x2cd   : > { %v1456_v54 = vpop.f32.mrb[24].mxu0 }
 0x2ce   : > { %v1036_v55 = vadd.f32 %v1456_v54, %v2030_v50  ;;  %v1027_v56 = vpop.f32.mrb[25].mxu0 }
 0x2cf   : > { %v1028_v57 = vadd.f32 %v2030_v50, %v1027_v56  ;;  %v1457_v58 = vpop.f32.mrb[26].mxu0 }
 0x2d0   : > { %1132 = vst [vmem:[%s2034_s20 + $0x50] sm:$0xff] %v1036_v55  ;;  %v1039_v59 = vadd.f32 %v1457_v58, %v2030_v50  ;;  %v1030_v60 = vpop.f32.mrb[27].mxu0 }
 0x2d1   : > { %1130 = vst [vmem:[%s2034_s20 + $0x40] sm:$0xff] %v1028_v57  ;;  %v1031_v61 = vadd.f32 %v2030_v50, %v1030_v60 }
 0x2d2   : > { %1133 = vst [vmem:[%s2034_s20 + $0x58] sm:$0xff] %v1039_v59 }
 0x2d3   : > { %1131 = vst [vmem:[%s2034_s20 + $0x48] sm:$0xff] %v1031_v61 }
 0x2d5   : > { %v1460_v63 = vpop.f32.mrb[28].mxu0 }
 0x2d6   : > { %v1052_v0 = vadd.f32 %v1460_v63, %v2030_v50  ;;  %v1043_v1 = vpop.f32.mrb[29].mxu0 }
 0x2d7   : > { %v1044_v2 = vadd.f32 %v2030_v50, %v1043_v1  ;;  %v1461_v3 = vpop.f32.mrb[30].mxu0 }
 0x2d8   : > { %1136 = vst [vmem:[%s2034_s20 + $0x70] sm:$0xff] %v1052_v0  ;;  %v1055_v4 = vadd.f32 %v1461_v3, %v2030_v50  ;;  %v1046_v5 = vpop.f32.mrb[31].mxu0 }
 0x2d9   : > { %1134 = vst [vmem:[%s2034_s20 + $0x60] sm:$0xff] %v1044_v2  ;;  %v1047_v6 = vadd.f32 %v2030_v50, %v1046_v5 }
 0x2da   : > { %1137 = vst [vmem:[%s2034_s20 + $0x78] sm:$0xff] %v1055_v4 }
 0x2db   : > { %1135 = vst [vmem:[%s2034_s20 + $0x68] sm:$0xff] %v1047_v6 }
 0x2dd   : > { %v1464_v7 = vpop.f32.mrb[32].mxu0 }
 0x2de   : > { %v1068_v8 = vadd.f32 %v1464_v7, %v2030_v50  ;;  %v1059_v9 = vpop.f32.mrb[33].mxu0 }
 0x2df   : > { %v1060_v10 = vadd.f32 %v2030_v50, %v1059_v9  ;;  %v1465_v11 = vpop.f32.mrb[34].mxu0 }
 0x2e0   : > { %1140 = vst [vmem:[%s2034_s20 + $0x90] sm:$0xff] %v1068_v8  ;;  %v1071_v12 = vadd.f32 %v1465_v11, %v2030_v50  ;;  %v1062_v13 = vpop.f32.mrb[35].mxu0 }
 0x2e1   : > { %1138 = vst [vmem:[%s2034_s20 + $0x80] sm:$0xff] %v1060_v10  ;;  %v1063_v14 = vadd.f32 %v2030_v50, %v1062_v13 }
 0x2e2   : > { %1141 = vst [vmem:[%s2034_s20 + $0x98] sm:$0xff] %v1071_v12 }
 0x2e3   : > { %1139 = vst [vmem:[%s2034_s20 + $0x88] sm:$0xff] %v1063_v14 }
 0x2e5   : > { %v1468_v15 = vpop.f32.mrb[36].mxu0 }
 0x2e6   : > { %v1084_v16 = vadd.f32 %v1468_v15, %v2030_v50  ;;  %v1075_v17 = vpop.f32.mrb[37].mxu0 }
 0x2e7   : > { %v1076_v18 = vadd.f32 %v2030_v50, %v1075_v17  ;;  %v1469_v19 = vpop.f32.mrb[38].mxu0 }
 0x2e8   : > { %1144 = vst [vmem:[%s2034_s20 + $0xb0] sm:$0xff] %v1084_v16  ;;  %v1087_v20 = vadd.f32 %v1469_v19, %v2030_v50  ;;  %v1078_v21 = vpop.f32.mrb[39].mxu0 }
 0x2e9   : > { %1142 = vst [vmem:[%s2034_s20 + $0xa0] sm:$0xff] %v1076_v18  ;;  %v1079_v22 = vadd.f32 %v2030_v50, %v1078_v21 }
 0x2ea   : > { %1145 = vst [vmem:[%s2034_s20 + $0xb8] sm:$0xff] %v1087_v20 }
 0x2eb   : > { %1143 = vst [vmem:[%s2034_s20 + $0xa8] sm:$0xff] %v1079_v22 }
 0x2ed   : > { %v1472_v23 = vpop.f32.mrb[40].mxu0 }
 0x2ee   : > { %v1100_v24 = vadd.f32 %v1472_v23, %v2030_v50  ;;  %v1091_v25 = vpop.f32.mrb[41].mxu0 }
 0x2ef   : > { %v1092_v26 = vadd.f32 %v2030_v50, %v1091_v25  ;;  %v1473_v27 = vpop.f32.mrb[42].mxu0 }
 0x2f0   : > { %1148 = vst [vmem:[%s2034_s20 + $0xd0] sm:$0xff] %v1100_v24  ;;  %v1103_v28 = vadd.f32 %v1473_v27, %v2030_v50  ;;  %v1094_v29 = vpop.f32.mrb[43].mxu0 }
 0x2f1   : > { %1146 = vst [vmem:[%s2034_s20 + $0xc0] sm:$0xff] %v1092_v26  ;;  %v1095_v30 = vadd.f32 %v2030_v50, %v1094_v29 }
 0x2f2   : > { %1149 = vst [vmem:[%s2034_s20 + $0xd8] sm:$0xff] %v1103_v28 }
 0x2f3   : > { %1147 = vst [vmem:[%s2034_s20 + $0xc8] sm:$0xff] %v1095_v30 }
 0x2f5   : > { %v1476_v31 = vpop.f32.mrb[44].mxu0 }
 0x2f6   : > { %v1116_v32 = vadd.f32 %v1476_v31, %v2030_v50  ;;  %v1107_v33 = vpop.f32.mrb[45].mxu0 }
 0x2f7   : > { %v1108_v34 = vadd.f32 %v2030_v50, %v1107_v33  ;;  %v1477_v35 = vpop.f32.mrb[46].mxu0 }
 0x2f8   : > { %1152 = vst [vmem:[%s2034_s20 + $0xf0] sm:$0xff] %v1116_v32  ;;  %v1119_v36 = vadd.f32 %v1477_v35, %v2030_v50  ;;  %v1110_v37 = vpop.f32.mrb[47].mxu0 }
 0x2f9   : > { %1150 = vst [vmem:[%s2034_s20 + $0xe0] sm:$0xff] %v1108_v34  ;;  %v1111_v38 = vadd.f32 %v2030_v50, %v1110_v37 }
 0x2fa   : > { %1153 = vst [vmem:[%s2034_s20 + $0xf8] sm:$0xff] %v1119_v36 }
 0x2fb   : > { %1151 = vst [vmem:[%s2034_s20 + $0xe8] sm:$0xff] %v1111_v38 }
 0x2fc   : > { %1682 = shalt.err (!%p1679_p3)
}
 0x2fd   : > { %s1683_s16 = scalar_lea.hbm %s2099_s8, 4096  ;;  %s1687_s19 = scalar_lea.hbm %s2157_s7, 8192 }
 0x2fe   : > { %p1684_p4 = scmp.ne.s32.totalorder %s2099_s8, %s1683_s16  ;;  %p1688_p9 = scmp.lt.u32.totalorder %s2099_s8, %s2157_s7 }
 0x2ff   : > { %p1689_p10 = scmp.lt.u32.totalorder %s1687_s19, %s1683_s16  ;;  %p1691_p12 = scmp.lt.u32.totalorder %s1683_s16, %s2099_s8 }
 0x300   : > { %p1685_p7 = pnand %p1684_p4, %p1814_p5 }
 0x301   : > { %p1690_p11 = por %p1689_p10, %p1688_p9 }
 0x302   : > { %p1686_p8 = pneg %p1685_p7 }
 0x303   : > { %p1692_p13 = por %p1691_p12, %p1690_p11 }
 0x305   : > { %p1693_p0 = pnand %p1692_p13, %p1686_p8 }
 0x307   : > { %1696 = shalt.err (!%p1693_p0)
}
 0x308   : > { %s1734_s23 = smov 128   ;;  %s1735_s29 = smov 8  }
 0x309   : > { %1482 = dma.vmem_to_hbm [thread:$0]  (%p1814_p5), %s2101_s22, 4096, %s2099_s8, %s2109_s28, %s1734_s23, %s1734_s23, %s1735_s29  }
 0x30a PF: > { %p1488_p1 = scmp.ge.s32.totalorder %s1731_s27, 2  ;;  %s1183_s9 = sand.u32 1, %s1719_s24  }
 0x30b   : > { %s1184_s13 = scalar_lea.sflag [#allocation3], %s1183_s9 }
 0x30c   : > { %p1485_p2 = pnand %p1488_p1, %p1818_p6 }
 0x30e   : > { %1714 = dma.done.wait (!%p1485_p2), %s1184_s13, 4096  }
 0x30f   : > { %1716 = vsyncadd (!%p1485_p2), %s1184_s13, 4294963200  ;;  %p17_p3 = scmp.ge.s32.totalorder %s1801_s30, 4   ;;  %s2160_s24 = smov %s1723_s25 }
 0x310   : > { %s2161_s25 = smov %s1727_s26  ;;  %s2162_s26 = smov %s1812_s10 }
 0x311   : > { %s2163_s27 = smov %s1801_s30  ;;  %19 = sbr.rel (!%p17_p3) target bundleno = 3 (0x3), region = 83 }
 0x318   :  { %1189 = vsyncpa [#allocation3], 1 }
 0x319   :  { %1191 = vsyncpa [#allocation3 + $0x1], 1 }

</bundles_post_ra>
